<compile_context>
chip_gen: v6e
topology: v6e:2x2x1
jax: 0.10.0
libtpu: 0.0.40
codegen_flags: <defaults>
</compile_context>

<pallas_src>
import functools
import math

import jax
import jax.numpy as jnp
from jax.experimental import pallas as pl
from jax.experimental.pallas import tpu as pltpu

LANES = 128            # lane width (last dim)
MAX_TILE_ROWS = 2048   # 2048 x 128 x 4 B = 1 MiB per f32 block

# NOTE: evaluated once at import time on the default backend.  Running under
# pltpu.force_tpu_interpret_mode on a TPU host would still take the hardware
# PRNG branch; gate on interpret mode too if that path ever matters.
_ON_TPU = jax.default_backend() == "tpu"


def _round_up(a, b):
    return ((a + b - 1) // b) * b


def _hash_u32(x):
    """splitmix32-style avalanche hash on uint32 (pure-jnp fallback only)."""
    x = x ^ (x >> jnp.uint32(16))
    x = x * jnp.uint32(0x7FEB352D)
    x = x ^ (x >> jnp.uint32(15))
    x = x * jnp.uint32(0x846CA68B)
    x = x ^ (x >> jnp.uint32(16))
    return x


def _counter_normal(seed_i32, row_offset, shape):
    """N(0,1) noise from a stateless counter hash + Box-Muller (CPU fallback)."""
    r = jax.lax.broadcasted_iota(jnp.uint32, shape, 0)
    c = jax.lax.broadcasted_iota(jnp.uint32, shape, 1)
    idx = (r + row_offset.astype(jnp.uint32)) * jnp.uint32(shape[1]) + c
    key = _hash_u32(seed_i32.astype(jnp.uint32) ^ jnp.uint32(0x9E3779B9))
    h1 = _hash_u32(idx ^ key)
    h2 = _hash_u32(idx ^ key ^ jnp.uint32(0x85EBCA6B))
    inv24 = jnp.float32(1.0 / 16777216.0)                       # 2^-24
    u1 = (h1 >> jnp.uint32(8)).astype(jnp.float32) * inv24      # [0, 1)
    u2 = (h2 >> jnp.uint32(8)).astype(jnp.float32) * inv24
    # Clamp truncates the extreme left Gaussian tail (negligible in practice).
    u1 = jnp.maximum(u1, jnp.float32(1e-7))                     # avoid log(0)
    return jnp.sqrt(-2.0 * jnp.log(u1)) * jnp.cos((2.0 * math.pi) * u2)


def gaussian_dropout_kernel(seed_ref, x_ref, o_ref, *, alpha):
    """out_tile = x_tile * (noise * alpha + 1), noise ~ N(0,1) elementwise."""
    i = pl.program_id(0)
    shape = x_ref.shape
    if _ON_TPU:
        # Hardware PRNG.  Multi-word seeding hashes (seed, tile index) together
        # -> an independent stream per tile, independent of grid iteration
        # order (safe with "parallel" dimension semantics / megacore sharding).
        pltpu.prng_seed(seed_ref[0], i)
        # TODO(synk): on v7x (3.2 TB/s HBM) the single EUP slot can become the
        # binding unit here; if a bundle dump shows EUP-bound, switch to a
        # paired Box-Muller from pltpu.prng_random_bits (sin AND cos per
        # log/sqrt) or bf16 noise to halve transcendentals per element.
        noise = pltpu.stateful_normal(shape, jnp.float32)        # ~ N(0, 1)
    else:
        # Stateless counter-hash Gaussian so the kernel also runs off-TPU /
        # in interpret mode (the stateful TPU PRNG has no CPU lowering).
        noise = _counter_normal(seed_ref[0], i * shape[0], shape)
    eps = noise * alpha + 1.0                                    # ~ N(1, alpha^2)
    # f32 compute kept for v5e portability (no bf16 VALU/EUP); HBM bytes are
    # unchanged for bf16 inputs since in/out stay in the input dtype.
    o_ref[...] = (x_ref[...].astype(jnp.float32) * eps).astype(o_ref.dtype)


def _pick_tile_rows(rows):
    """Rows per block: lane-dense, <=1 MiB f32, and an even balanced tile count
    so the 'parallel' grid axis splits evenly over v7x's two TensorCores."""
    if rows <= 8:
        return rows                                  # single full-extent block
    pairs = pl.cdiv(rows, 2 * MAX_TILE_ROWS)         # how many tile-pairs
    tile = _round_up(pl.cdiv(rows, 2 * pairs), 8)    # sublane-aligned
    return min(tile, MAX_TILE_ROWS)


def gaussian_dropout(x, seed, alpha=1.0, training=True):
    """out = x * e with e ~ N(1, alpha^2) elementwise (identity when not training)."""
    if not training:
        return x

    orig_shape = x.shape
    n = x.size
    xf = jnp.reshape(x, (-1,))

    # Lane-aligned bulk runs through the Pallas kernel with zero extra copies;
    # a non-aligned tail (< 128 elements, rare) is a tiny plain-XLA epilogue.
    # No whole-array pad / slice round trips through HBM.
    n_bulk = (n // LANES) * LANES
    out_bulk = None
    if n_bulk:
        rows = n_bulk // LANES
        x2 = (xf if n_bulk == n else xf[:n_bulk]).reshape(rows, LANES)

        tile_rows = _pick_tile_rows(rows)
        num_tiles = pl.cdiv(rows, tile_rows)
        # 3-deep pipelining on long grids hides DMA-issue jitter at tile
        # boundaries; default double-buffering when there are only 1-2 tiles.
        bufs = 3 if num_tiles > 2 else 2
        tile_spec = lambda: pl.BlockSpec((tile_rows, LANES), lambda i: (i, 0),
                                         pipeline_mode=pl.Buffered(bufs))

        seed_arr = jnp.asarray([seed], dtype=jnp.int32)
        itemsize = jnp.dtype(x.dtype).itemsize

        out2 = pl.pallas_call(
            functools.partial(gaussian_dropout_kernel, alpha=float(alpha)),
            out_shape=jax.ShapeDtypeStruct((rows, LANES), x.dtype),
            grid_spec=pltpu.PrefetchScalarGridSpec(
                num_scalar_prefetch=0,
                grid=(num_tiles,),
                in_specs=[
                    pl.BlockSpec(memory_space=pltpu.MemorySpace.SMEM),  # seed
                    tile_spec(),                                        # x tile
                ],
                out_specs=tile_spec(),
            ),
            # Per-tile reseeding makes every grid step order-independent, so
            # v7x can shard the grid over both TensorCores; neutral on
            # single-TC v5e / v6e.
            compiler_params=pltpu.CompilerParams(
                dimension_semantics=("parallel",),
                # 1 MiB blocks x (3 in + 3 out) buffers ~= 6 MiB; 32 MiB limit
                # leaves headroom and respects v7x's 64 MiB physical VMEM.
                vmem_limit_bytes=32 * 1024 * 1024,
            ),
            cost_estimate=pl.CostEstimate(
                flops=int(4 * n_bulk),
                transcendentals=int(3 * n_bulk),
                bytes_accessed=int(2 * n_bulk * itemsize),
            ),
        )(seed_arr, x2)
        out_bulk = out2.reshape(-1)

    if n_bulk == n:
        return out_bulk.reshape(orig_shape)

    # Tail (< 128 elements): plain XLA with a stateless noise stream.
    tail = xf[n_bulk:]
    tkey = jax.random.fold_in(jax.random.PRNGKey(seed), 0x7A11)
    eps_tail = jax.random.normal(tkey, tail.shape, jnp.float32) * float(alpha) + 1.0
    out_tail = (tail.astype(jnp.float32) * eps_tail).astype(x.dtype)
    out_flat = jnp.concatenate([out_bulk, out_tail]) if n_bulk else out_tail
    return out_flat.reshape(orig_shape)


if __name__ == "__main__":
    key = jax.random.PRNGKey(0)
    # Module __init__: alpha = 1.0.
    alpha = 1.0

    # Small NCHW input consistent with a typical conv activation.
    x = jax.random.normal(key, (2, 4, 16, 16), dtype=jnp.float32)

    out = jax.block_until_ready(gaussian_dropout(x, seed=0, alpha=alpha, training=True))
    assert out.shape == x.shape and out.dtype == x.dtype
    assert bool(jnp.all(jnp.isfinite(out)))

    # Eval mode is identity.
    out_eval = jax.block_until_ready(gaussian_dropout(x, seed=0, alpha=alpha, training=False))
    assert bool(jnp.all(out_eval == x))

    print("KERNEL_OK")
</pallas_src>

<mosaic_0001>
module attributes {stable_mosaic.version = 11 : i64} {
  func.func @gaussian_dropout_kernel(%arg0: i32, %arg1: memref<1xi32, #tpu.memory_space<smem>>, %arg2: memref<8x128xf32, #tpu.memory_space<vmem>>, %arg3: memref<8x128xf32, #tpu.memory_space<vmem>>) attributes {dimension_semantics = [#tpu.dimension_semantics<parallel>], iteration_bounds = array<i64: 2>, scalar_prefetch = 0 : i64, scratch_operands = 0 : i64, tpu.core_type = #tpu.core_type<tc>, window_params = [{transform_indices = @transform_0, window_bounds = array<i64: 1>}, {pipeline_mode = #tpu.pipeline_mode<double_buffered>, transform_indices = @transform_1, window_bounds = array<i64: 8, 128>}, {pipeline_mode = #tpu.pipeline_mode<double_buffered>, transform_indices = @transform_2, window_bounds = array<i64: 8, 128>}]} {
    %c0 = arith.constant 0 : index
    %0 = memref.load %arg1[%c0] : memref<1xi32, #tpu.memory_space<smem>>
    %c8_i32 = arith.constant 8 : i32
    %1 = arith.muli %arg0, %c8_i32 : i32
    %2 = tpu.iota {dimensions = array<i32: 0>} : vector<8x128xi32>
    %3 = tpu.iota {dimensions = array<i32: 1>} : vector<8x128xi32>
    %4 = vector.broadcast %1 : i32 to vector<8x128xi32>
    %5 = arith.addi %2, %4 : vector<8x128xi32>
    %c128_i32 = arith.constant 128 : i32
    %6 = vector.broadcast %c128_i32 : i32 to vector<8x128xi32>
    %7 = arith.muli %5, %6 : vector<8x128xi32>
    %8 = arith.addi %7, %3 : vector<8x128xi32>
    %c-1640531527_i32 = arith.constant -1640531527 : i32
    %9 = arith.xori %0, %c-1640531527_i32 : i32
    %c16_i32 = arith.constant 16 : i32
    %10 = arith.shrui %9, %c16_i32 : i32
    %11 = arith.xori %9, %10 : i32
    %c2146121005_i32 = arith.constant 2146121005 : i32
    %12 = arith.muli %11, %c2146121005_i32 : i32
    %c15_i32 = arith.constant 15 : i32
    %13 = arith.shrui %12, %c15_i32 : i32
    %14 = arith.xori %12, %13 : i32
    %c-2073254261_i32 = arith.constant -2073254261 : i32
    %15 = arith.muli %14, %c-2073254261_i32 : i32
    %c16_i32_0 = arith.constant 16 : i32
    %16 = arith.shrui %15, %c16_i32_0 : i32
    %17 = arith.xori %15, %16 : i32
    %18 = vector.broadcast %17 : i32 to vector<8x128xi32>
    %19 = arith.xori %8, %18 : vector<8x128xi32>
    %c16_i32_1 = arith.constant 16 : i32
    %20 = vector.broadcast %c16_i32_1 : i32 to vector<8x128xi32>
    %21 = arith.shrui %19, %20 : vector<8x128xi32>
    %22 = arith.xori %19, %21 : vector<8x128xi32>
    %c2146121005_i32_2 = arith.constant 2146121005 : i32
    %23 = vector.broadcast %c2146121005_i32_2 : i32 to vector<8x128xi32>
    %24 = arith.muli %22, %23 : vector<8x128xi32>
    %c15_i32_3 = arith.constant 15 : i32
    %25 = vector.broadcast %c15_i32_3 : i32 to vector<8x128xi32>
    %26 = arith.shrui %24, %25 : vector<8x128xi32>
    %27 = arith.xori %24, %26 : vector<8x128xi32>
    %c-2073254261_i32_4 = arith.constant -2073254261 : i32
    %28 = vector.broadcast %c-2073254261_i32_4 : i32 to vector<8x128xi32>
    %29 = arith.muli %27, %28 : vector<8x128xi32>
    %c16_i32_5 = arith.constant 16 : i32
    %30 = vector.broadcast %c16_i32_5 : i32 to vector<8x128xi32>
    %31 = arith.shrui %29, %30 : vector<8x128xi32>
    %32 = arith.xori %29, %31 : vector<8x128xi32>
    %33 = vector.broadcast %17 : i32 to vector<8x128xi32>
    %34 = arith.xori %8, %33 : vector<8x128xi32>
    %c-2048144789_i32 = arith.constant -2048144789 : i32
    %35 = vector.broadcast %c-2048144789_i32 : i32 to vector<8x128xi32>
    %36 = arith.xori %34, %35 : vector<8x128xi32>
    %c16_i32_6 = arith.constant 16 : i32
    %37 = vector.broadcast %c16_i32_6 : i32 to vector<8x128xi32>
    %38 = arith.shrui %36, %37 : vector<8x128xi32>
    %39 = arith.xori %36, %38 : vector<8x128xi32>
    %c2146121005_i32_7 = arith.constant 2146121005 : i32
    %40 = vector.broadcast %c2146121005_i32_7 : i32 to vector<8x128xi32>
    %41 = arith.muli %39, %40 : vector<8x128xi32>
    %c15_i32_8 = arith.constant 15 : i32
    %42 = vector.broadcast %c15_i32_8 : i32 to vector<8x128xi32>
    %43 = arith.shrui %41, %42 : vector<8x128xi32>
    %44 = arith.xori %41, %43 : vector<8x128xi32>
    %c-2073254261_i32_9 = arith.constant -2073254261 : i32
    %45 = vector.broadcast %c-2073254261_i32_9 : i32 to vector<8x128xi32>
    %46 = arith.muli %44, %45 : vector<8x128xi32>
    %c16_i32_10 = arith.constant 16 : i32
    %47 = vector.broadcast %c16_i32_10 : i32 to vector<8x128xi32>
    %48 = arith.shrui %46, %47 : vector<8x128xi32>
    %49 = arith.xori %46, %48 : vector<8x128xi32>
    %c8_i32_11 = arith.constant 8 : i32
    %50 = vector.broadcast %c8_i32_11 : i32 to vector<8x128xi32>
    %51 = arith.shrui %32, %50 : vector<8x128xi32>
    %52 = arith.uitofp %51 : vector<8x128xi32> to vector<8x128xf32>
    %cst = arith.constant 5.96046448E-8 : f32
    %53 = vector.broadcast %cst : f32 to vector<8x128xf32>
    %54 = arith.mulf %52, %53 : vector<8x128xf32>
    %c8_i32_12 = arith.constant 8 : i32
    %55 = vector.broadcast %c8_i32_12 : i32 to vector<8x128xi32>
    %56 = arith.shrui %49, %55 : vector<8x128xi32>
    %57 = arith.uitofp %56 : vector<8x128xi32> to vector<8x128xf32>
    %cst_13 = arith.constant 5.96046448E-8 : f32
    %58 = vector.broadcast %cst_13 : f32 to vector<8x128xf32>
    %59 = arith.mulf %57, %58 : vector<8x128xf32>
    %cst_14 = arith.constant 1.000000e-07 : f32
    %60 = vector.broadcast %cst_14 : f32 to vector<8x128xf32>
    %61 = arith.maximumf %54, %60 : vector<8x128xf32>
    %62 = math.log %61 : vector<8x128xf32>
    %cst_15 = arith.constant -2.000000e+00 : f32
    %63 = vector.broadcast %cst_15 : f32 to vector<8x128xf32>
    %64 = arith.mulf %63, %62 : vector<8x128xf32>
    %65 = math.sqrt %64 : vector<8x128xf32>
    %cst_16 = arith.constant 6.28318548 : f32
    %66 = vector.broadcast %cst_16 : f32 to vector<8x128xf32>
    %67 = arith.mulf %66, %59 : vector<8x128xf32>
    %68 = math.cos %67 : vector<8x128xf32>
    %69 = arith.mulf %65, %68 : vector<8x128xf32>
    %cst_17 = arith.constant 1.000000e+00 : f32
    %70 = vector.broadcast %cst_17 : f32 to vector<8x128xf32>
    %71 = arith.mulf %69, %70 : vector<8x128xf32>
    %cst_18 = arith.constant 1.000000e+00 : f32
    %72 = vector.broadcast %cst_18 : f32 to vector<8x128xf32>
    %73 = arith.addf %71, %72 : vector<8x128xf32>
    %c0_19 = arith.constant 0 : index
    %c0_20 = arith.constant 0 : index
    %74 = vector.load %arg2[%c0_19, %c0_20] : memref<8x128xf32, #tpu.memory_space<vmem>>, vector<8x128xf32>
    %75 = arith.mulf %74, %73 : vector<8x128xf32>
    %c0_21 = arith.constant 0 : index
    %c0_22 = arith.constant 0 : index
    %76 = vector.load %arg3[%c0_21, %c0_22] : memref<8x128xf32, #tpu.memory_space<vmem>>, vector<8x128xf32>
    tpu.vector_store %arg3[%c0_21, %c0_22], %75 {strides = array<i32>} : memref<8x128xf32, #tpu.memory_space<vmem>>, vector<8x128xf32>,
    return
  }
  func.func @transform_0(%arg0: i32) -> i32 {
    %c0_i32 = arith.constant 0 : i32
    %c0_i32_0 = arith.constant 0 : i32
    return %c0_i32 : i32
  }
  func.func @transform_1(%arg0: i32) -> (i32, i32) {
    %c0_i32 = arith.constant 0 : i32
    %c0_i32_0 = arith.constant 0 : i32
    return %arg0, %c0_i32 : i32, i32
  }
  func.func @transform_2(%arg0: i32) -> (i32, i32) {
    %c0_i32 = arith.constant 0 : i32
    %c0_i32_0 = arith.constant 0 : i32
    return %arg0, %c0_i32 : i32, i32
  }
}

</mosaic_0001>

<bundles_post_ra>
// kernel: tpu_custom_call.1
= control target key start
LH: loop header
LB: loop body
LE: loop exit
PB: predicated region body
PF: predicated region fallthrough
CT: control target
= control target key end

     0   :  { %s798_s0 = inlined_call_operand.<no memory space> [shape: s32[1], index: 0, kind: input, shape index: {}]   ;;  %s799_s1 = inlined_call_operand.hbm [shape: f32[16,128], index: 1, kind: input, shape index: {}]   ;;  %s800_s2 = inlined_call_operand.hbm [shape: f32[16,128], index: 2, kind: output, shape index: {}]  }
   0x1   :  { %7 = sst [smem:[#allocation2]] %s798_s0 }
   0x2   :  { %8 = vsyncpa [#allocation4], 0 }
   0x3   :  { %10 = vsyncpa [#allocation4 + $0x1], 0 }
   0x4   :  { %11 = vsyncpa [#allocation5], 0 }
   0x5   :  { %13 = vsyncpa [#allocation5 + $0x1], 0  ;;  %s619_s11 = smov 0   ;;  %s621_s12 = smov 0  }
   0x6   :  { %s623_s13 = smov 0   ;;  %s625_s14 = smov 0  }
   0x7 LB: > { %s640_s0 = sadd.s32 4294967295, %s591_s14   ;;  %s418_s15 = sadd.s32 4294967294, %s591_s14   ;;  %s591_s14 = sphi %s625_s14, %s817_s14   ;;  %s587_s13 = sphi %s623_s13, %s816_s13   ;;  %s583_s12 = sphi %s621_s12, %s815_s12   ;;  %s579_s11 = sphi %s619_s11, %s814_s11  }
   0x8   : > { %s644_s16 = sadd.s32 1, %s591_s14   ;;  %s47_s17 = sadd.s32 1, %s587_s13 }
   0x9   : > { %s44_s18 = ssub.s32 %s591_s14, %s644_s16  ;;  %p54_p0 = scmp.ne.s32.totalorder %s587_s13, %s583_s12 }
   0xa   : > { %p45_p1 = scmp.eq.s32.totalorder %s44_s18, 0  ;;  %p55_p2 = scmp.eq.s32.totalorder %s591_s14, 0 }
   0xb   : > { %p60_p3 = scmp.ne.s32.totalorder %s583_s12, %s579_s11  ;;  %p61_p4 = scmp.eq.s32.totalorder %s640_s0, 0 }
   0xc   : > { %s656_s19 = scalar_select %p45_p1, %s587_s13, %s47_s17  }
   0xd   : > { %p658_p5 = por %p55_p2, %p54_p0  ;;  %p662_p6 = por %p61_p4, %p60_p3 }
   0xe   : > { %p84_p7 = scmp.eq.s32.totalorder %s640_s0, 1  ;;  %p90_p8 = scmp.eq.s32.totalorder %s418_s15, 1 }
   0xf   : > { %s804_s21 = scalar_select %p662_p6, 1, 0 }
  0x10   : > { %p451_p10 = scmp.lt.s32.totalorder %s591_s14, 2  ;;  %p669_p11 = por %p84_p7, %p54_p0 }
  0x11   : > { %p673_p12 = por %p90_p8, %p60_p3  ;;  %s113_s24 = sand.u32 1, %s587_s13  }
  0x12   : > { %s805_s22 = scalar_select %p669_p11, 1, 0 }
  0x13   : > { %s806_s23 = scalar_select %p673_p12, 1, 0 }
  0x14   : > { %s422_s25 = sshll.u32 %s591_s14, 7  ;;  %s421_s26 = sshll.u32 %s113_s24, 3 }
  0x15   : > { %s682_s29 = scalar_lea.hbm %s799_s1, %s422_s25  ;;  %s117_s30 = scalar_lea.vmem [#allocation3], %s421_s26 }
  0x16   : > { %s124_s3 = sshll.u32 %s117_s30, 4  ;;  %p686_p13 = pnand %p451_p10, %p658_p5  ;;  %s690_s3 = int_to_ptr.vmem [resolvable:$true] %s124_s3 }
  0x17   : > { %s114_s5 = scalar_lea.sflag [#allocation4], %s113_s24  ;;  %s499_s6 = scalar_lea.hbm %s682_s29, 128 }
  0x18   : > { %p500_p2 = scmp.ne.s32.totalorder %s682_s29, %s499_s6  ;;  %p501_p3 = pneg %p686_p13 }
  0x19   : > { %s504_s9 = scalar_lea.hbm %s799_s1, 256  ;;  %p505_p5 = scmp.lt.s32.totalorder %s682_s29, %s799_s1 }
  0x1a   : > { %p502_p4 = pnand %p501_p3, %p500_p2  ;;  %p506_p8 = scmp.lt.s32.totalorder %s504_s9, %s499_s6 }
  0x1c   : > { %p503_p7 = pneg %p502_p4  ;;  %p507_p10 = por %p506_p8, %p505_p5 }
  0x1e   : > { %p508_p9 = pnand %p507_p10, %p503_p7 }
  0x20   : > { %511 = shalt.err (!%p508_p9)
}
  0x21   : > { %s512_s17 = scalar_lea.vmem %s690_s3, 128  ;;  %s593_s18 = smov [#allocation3]  }
  0x22   : > { %p513_p0 = scmp.ne.s32.totalorder %s690_s3, %s512_s17  ;;  %s517_s20 = sshll.u32 %s593_s18, 4  ;;  %s518_s20 = int_to_ptr.vmem [resolvable:$false] %s517_s20 }
  0x23   : > { %s519_s24 = scalar_lea.vmem %s518_s20, 256  ;;  %p520_p4 = scmp.lt.s32.totalorder %s690_s3, %s518_s20 }
  0x24   : > { %p515_p1 = pnand %p513_p0, %p501_p3  ;;  %p521_p12 = scmp.lt.s32.totalorder %s519_s24, %s512_s17 }
  0x26   : > { %p516_p2 = pneg %p515_p1  ;;  %p522_p11 = por %p521_p12, %p520_p4 }
  0x28   : > { %p523_p6 = pnand %p522_p11, %p516_p2 }
  0x2a   : > { %526 = shalt.err (!%p523_p6)
}
  0x2b   : > { %446 = dma.hbm_to_vmem [thread:$0]  (!%p686_p13), %s682_s29, 128, %s690_s3, %s114_s5  }
  0x2c   : > { %p808_p9 = scmp.lt.s32.totalorder %s591_s14, 3  ;;  %p809_p7 = scmp.ge.s32.totalorder %s591_s14, 1 }
  0x2e   : > { %p130_p0 = pnand %p809_p7, %p808_p9 }
  0x2f   : > { %s717_s25 = sand.u32 (!%p130_p0), 1, %s583_s12   ;;  %p810_p6 = scmp.ne.s32.totalorder (!%p130_p0), %s804_s21, 0 }
  0x30   : > { %133 = sbr.rel (%p130_p0) target bundleno = 208 (0xd0), region = 28  ;;  %s424_s26 = sshll.u32 (!%p130_p0), %s717_s25, 3 }
  0x31   : > { %s136_s27 = scalar_lea.sflag (!%p130_p0), [#allocation4], %s717_s25  ;;  %s723_s28 = scalar_lea.vmem (!%p130_p0), [#allocation3], %s424_s26 }
  0x35   : > { %570 = dma.done.wait (%p810_p6), %s136_s27, 128  }
  0x36   : > { %572 = vsyncadd (%p810_p6), %s136_s27, 4294967168  ;;  %v162_v0 = vlaneseq  ;;  %s160_s29 = sld [smem:[#allocation2]]  ;;  %s426_s30 = sshll.u32 %s640_s0, 3  ;;  %v594_v50 = vmov 683565275  }
  0x37   : > { %v166_v2 = vstv %s426_s30  ;;  %v595_v52 = vmov 2475754826   ;;  %v596_v54 = vmov 2131351028   ;;  %v597_v56 = vmov 2102212464  }
  0x38   : > { %v163_v1 = vshrl.u32 %v162_v0, 7  ;;  %v165_v4 = vand.u32 127, %v162_v0  ;;  %v598_v60 = vmov 920167782   ;;  %s159_s15 = scalar_lea.vmem [#allocation6], %s424_s26  ;;  %s432_s18 = sshll.u32 %s640_s0, 7 }
  0x39   : > { %s348_s17 = sshll.u32 %s159_s15, 4  ;;  %s346_s27 = scalar_lea.hbm %s800_s2, %s432_s18  ;;  %s758_s17 = int_to_ptr.vmem [resolvable:$true] %s348_s17 }
  0x3a   : > { %v167_v3 = vadd.s32 %v166_v2, %v163_v1  ;;  %v599_v1 = vmov 1326507024   ;;  %s527_s30 = scalar_lea.vmem %s758_s17, 128  ;;  %p811_p12 = scmp.ne.s32.totalorder %s805_s22, 0 }
  0x3b   : > { %p528_p11 = scmp.ne.s32.totalorder %s758_s17, %s527_s30  ;;  %s600_s26 = smov [#allocation6]  }
  0x3c   : > { %s170_s3 = sxor.u32 2654435769, %s160_s29  ;;  %v168_v5 = vmul.u32 128, %v167_v3  ;;  %s335_s29 = scalar_lea.sflag [#allocation5], %s717_s25 }
  0x3d   : > { %s171_s4 = sshrl.u32 %s170_s3, 16  ;;  %p529_p13 = pnand %p528_p11, %p811_p12 }
  0x3e   : > { %s172_s5 = sxor.u32 %s171_s4, %s170_s3  ;;  %v169_v6 = vadd.s32 %v168_v5, %v165_v4  ;;  %s531_s0 = sshll.u32 %s600_s26, 4  ;;  %s532_s0 = int_to_ptr.vmem [resolvable:$false] %s531_s0 }
  0x3f   : > { %s173_s6 = smul.u32 2146121005, %s172_s5  ;;  %p530_p1 = pneg %p529_p13 }
  0x40   : > { %p534_p3 = scmp.lt.s32.totalorder %s758_s17, %s532_s0 }
  0x41   : > { %s174_s7 = sshrl.u32 %s173_s6, 15 }
  0x42   : > { %s175_s8 = sxor.u32 %s174_s7, %s173_s6 }
  0x43   : > { %s176_s9 = smul.u32 2221713035, %s175_s8 }
  0x45   : > { %s177_s10 = sshrl.u32 %s176_s9, 16 }
  0x46   : > { %s178_s21 = sxor.u32 %s177_s10, %s176_s9 }
  0x47   : > { %v179_v7 = vstv %s178_s21 }
  0x48   : > { %v180_v8 = vxor.u32 %v179_v7, %v169_v6 }
  0x4a   : > { %v189_v9 = vxor.u32 2246822507, %v180_v8  ;;  %v181_v11 = vshrl.u32 %v180_v8, 16 }
  0x4c   : > { %v190_v10 = vshrl.u32 %v189_v9, 16  ;;  %v182_v14 = vxor.u32 %v181_v11, %v180_v8 }
  0x4e   : > { %v191_v12 = vxor.u32 %v190_v10, %v189_v9  ;;  %v183_v17 = vmul.u32 2146121005, %v182_v14 }
  0x50   : > { %v192_v13 = vmul.u32 2146121005, %v191_v12  ;;  %v184_v20 = vshrl.u32 %v183_v17, 15 }
  0x52   : > { %v193_v15 = vshrl.u32 %v192_v13, 15  ;;  %v185_v23 = vxor.u32 %v184_v20, %v183_v17 }
  0x54   : > { %v194_v16 = vxor.u32 %v193_v15, %v192_v13  ;;  %v186_v28 = vmul.u32 2221713035, %v185_v23 }
  0x56   : > { %v195_v18 = vmul.u32 2221713035, %v194_v16  ;;  %v187_v31 = vshrl.u32 %v186_v28, 16 }
  0x58   : > { %v196_v19 = vshrl.u32 %v195_v18, 16  ;;  %v188_v34 = vxor.u32 %v187_v31, %v186_v28 }
  0x5a   : > { %v197_v21 = vxor.u32 %v196_v19, %v195_v18  ;;  %v198_v37 = vshrl.u32 %v188_v34, 8 }
  0x5c   : > { %v206_v22 = vshrl.u32 %v197_v21, 8  ;;  %v199_v41 = vshrl.u32 %v198_v37, 16  ;;  %v200_v45 = vand.u32 65535, %v198_v37 }
  0x5e   : > { %v207_v24 = vshrl.u32 %v206_v22, 16  ;;  %v208_v25 = vand.u32 65535, %v206_v22  ;;  %v201_v46 = vcvt.s32.f32 %v199_v41  ;;  %v203_v4 = vcvt.s32.f32 %v200_v45 }
  0x60   : > { %v209_v26 = vcvt.s32.f32 %v207_v24  ;;  %v211_v27 = vcvt.s32.f32 %v208_v25  ;;  %v202_v3 = vmul.f32 65536.0, %v201_v46 }
  0x62   : > { %v210_v29 = vmul.f32 65536.0, %v209_v26  ;;  %v204_v25 = vadd.f32 %v203_v4, %v202_v3 }
  0x64   : > { %v212_v30 = vadd.f32 %v211_v27, %v210_v29 }
  0x66   : > { %v213_v32 = vmul.f32 5.9604645e-08, %v212_v30  ;;  %v205_v30 = vmul.f32 5.9604645e-08, %v204_v25 }
  0x68   : > { %v730_v33 = vmul.f32 6.2831855, %v213_v32  ;;  %v214_v34 = vmax.f32 %v205_v30, 1e-07 }
  0x6a   : > { %v229_v35 = vand.u32 2139095040, %v730_v33  ;;  %v226_v38 = vand.u32 2147483647, %v730_v33  ;;  %491 = vlog2.f32 %v214_v34  ;;  %vm228_vm7 = vcmp.lt.s32.totalorder %v730_v33, 0 }
  0x6b   : > { %vm318_vm14 = vweird.f32 %v730_v33 }
  0x6c   : > { %v230_v36 = vshrl.u32 %v229_v35, 23  ;;  %v233_v42 = vand.u32 8388607, %v226_v38  ;;  %vm227_vm8 = vcmp.le.f32.partialorder %v226_v38, 0.7853982 }
  0x6e   : > { %v427_v39 = vadd.s32 4294967169, %v230_v36  ;;  %v234_v47 = vor.u32 8388608, %v233_v42 }
  0x70   : > { %v236_v40 = vadd.s32 1, %v427_v39  ;;  %v274_v5 = vshll.u32 %v234_v47, 8 }
  0x72   : > { %vm237_vm0 = vcmp.gt.s32.totalorder %v236_v40, 0 }
  0x73   : > { %v238_v43 = vsel %vm237_vm0, %v236_v40, 0 }
  0x74   : > { %v240_v44 = vand.u32 31, %v238_v43  ;;  %v239_v48 = vshrl.u32 %v238_v43, 5 }
  0x76   : > { %v241_v49 = vsub.s32 32, %v240_v44  ;;  %v243_v51 = vshll.u32 %v594_v50, %v240_v44  ;;  %v246_v53 = vshll.u32 %v595_v52, %v240_v44  ;;  %v249_v55 = vshll.u32 %v596_v54, %v240_v44 }
  0x77   : > { %v252_v57 = vshll.u32 %v597_v56, %v240_v44  ;;  %v255_v61 = vshll.u32 %v598_v60, %v240_v44  ;;  %vm258_vm1 = vcmp.lt.s32.totalorder %v239_v48, 1  ;;  %vm259_vm2 = vcmp.lt.s32.totalorder %v239_v48, 2  ;;  %v492_v45 = vpop.eup %491 }
  0x78   : > { %v244_v58 = vshrl.u32 %v595_v52, %v241_v49  ;;  %v247_v59 = vshrl.u32 %v596_v54, %v241_v49  ;;  %v242_v62 = vshrl.u32 %v594_v50, %v241_v49  ;;  %v250_v63 = vshrl.u32 %v597_v56, %v241_v49 }
  0x79   : > { %v253_v0 = vshrl.u32 %v598_v60, %v241_v49  ;;  %v256_v2 = vshrl.u32 %v599_v1, %v241_v49  ;;  %vm260_vm3 = vcmp.lt.s32.totalorder %v239_v48, 3  ;;  %vm261_vm4 = vcmp.lt.s32.totalorder %v239_v48, 4 }
  0x7a   : > { %v245_v6 = vor.u32 %v244_v58, %v243_v51  ;;  %v248_v7 = vor.u32 %v247_v59, %v246_v53  ;;  %v251_v8 = vor.u32 %v250_v63, %v249_v55  ;;  %v216_v50 = vmul.f32 0.6931472, %v492_v45 }
  0x7b   : > { %v254_v9 = vor.u32 %v253_v0, %v252_v57  ;;  %v257_v10 = vor.u32 %v256_v2, %v255_v61 }
  0x7c   : > { %v262_v11 = vsel %vm258_vm1, %v242_v62, %v245_v6  ;;  %v263_v12 = vsel %vm261_vm4, %v251_v8, 2102212464  ;;  %v266_v13 = vsel %vm258_vm1, %v245_v6, %v248_v7  ;;  %v270_v17 = vsel %vm258_vm1, %v248_v7, %v251_v8 }
  0x7d   : > { %v267_v14 = vsel %vm261_vm4, %v254_v9, 920167782  ;;  %v264_v15 = vsel %vm260_vm3, %v248_v7, %v263_v12  ;;  %v271_v18 = vsel %vm261_vm4, %v257_v10, 1326507024  ;;  %v217_v55 = vmul.f32 -2.0, %v216_v50 }
  0x7e   : > { %v268_v16 = vsel %vm260_vm3, %v251_v8, %v267_v14  ;;  %v272_v20 = vsel %vm260_vm3, %v254_v9, %v271_v18  ;;  %v265_v21 = vsel %vm259_vm2, %v262_v11, %v264_v15 }
  0x7f   : > { %v269_v19 = vsel %vm259_vm2, %v266_v13, %v268_v16  ;;  %v273_v22 = vsel %vm259_vm2, %v270_v17, %v272_v20  ;;  %v281_v28 = vmul.u32 %v274_v5, %v265_v21  ;;  %493 = vrsqrt.f32 %v217_v55  ;;  %v331_v16 = vld [vmem:[%s723_s28] sm:$0xff]  ;;  %s533_s28 = scalar_lea.vmem %s532_s0, 256 }
  0x80   : > { %v739_v23 = vmul.u32.u64.low %v274_v5, %v269_v19  ;;  %v740_v24 = vmul.u32.u64.high %v274_v5, %v269_v19, %v739_v23  ;;  %v742_v26 = vmul.u32.u64.low %v274_v5, %v273_v22  ;;  %v743_v27 = vmul.u32.u64.high %v274_v5, %v273_v22, %v742_v26  ;;  %p535_p5 = scmp.lt.s32.totalorder %s533_s28, %s527_s30 }
  0x81   : > { %vm220_vm9 = vcmp.eq.f32.partialorder %v217_v55, inf  ;;  %v223_v6 = vand.u32 2147483648, %v217_v55  ;;  %vm222_vm11 = vcmp.eq.f32.partialorder %v217_v55, 0.0 }
  0x82   : > { %v284_v29 = vadd.s32 1, %v740_v24  ;;  %vm283_vm5 = vc.u32 %v743_v27, %v739_v23  ;;  %v282_v44 = vadd.s32 %v739_v23, %v743_v27  ;;  %p536_p8 = por %p535_p5, %p534_p3 }
  0x84   : > { %v285_v31 = vsel %vm283_vm5, %v284_v29, %v740_v24  ;;  %p537_p10 = pnand %p536_p8, %p530_p1 }
  0x85   : > { %v286_v32 = vadd.s32 %v285_v31, %v281_v28 }
  0x87   : > { %v287_v35 = vadd.s32 536870912, %v286_v32 }
  0x89   : > { %v288_v36 = vshrl.u32 %v287_v35, 30 }
  0x8b   : > { %v289_v37 = vshll.u32 %v288_v36, 30  ;;  %v312_v62 = vsub.s32 4, %v288_v36 }
  0x8c   : > { %v494_v2 = vpop.eup %493 }
  0x8d   : > { %v290_v39 = vsub.s32 %v286_v32, %v289_v37  ;;  %v313_v0 = vsel %vm228_vm7, %v312_v62, %v288_v36  ;;  %v219_v4 = vmul.f32 %v494_v2, %v217_v55 }
  0x8e   : > { %v315_v1 = vsel %vm227_vm8, 0, %v313_v0 }
  0x8f   : > { %v292_v40 = vsub.s32 0, %v290_v39  ;;  %v319_v3 = vand.u32 3, %v315_v1  ;;  %v221_v38 = vsel %vm220_vm9, %v217_v55, %v219_v4 }
  0x90   : > { %v224_v11 = vsel %vm222_vm11, %v223_v6, %v221_v38 }
  0x91   : > { %v428_v41 = vmin.u32 %v292_v40, %v290_v39  ;;  %vm324_vm10 = vcmp.eq.s32.totalorder %v319_v3, 2  ;;  %vm321_vm12 = vcmp.eq.s32.totalorder %v319_v3, 0  ;;  %vm320_vm13 = vcmp.lt.s32.totalorder %v319_v3, 2 }
  0x93   : > { %v294_v42 = vclz %v428_v41 }
  0x95   : > { %v429_v43 = vadd.s32 4294967294, %v294_v42 }
  0x97   : > { %vm430_vm6 = vcmp.lt.s32.totalorder %v429_v43, 0 }
  0x98   : > { %v297_v46 = vsel %vm430_vm6, 0, %v429_v43 }
  0x99   : > { %v298_v47 = vsub.s32 32, %v297_v46  ;;  %v299_v48 = vshll.u32 %v290_v39, %v297_v46  ;;  %v302_v49 = vsub.s32 4294967266, %v297_v46 }
  0x9b   : > { %v300_v51 = vshrl.u32 %v282_v44, %v298_v47  ;;  %v303_v52 = vadd.s32 127, %v302_v49 }
  0x9d   : > { %v301_v53 = vor.u32 %v300_v51, %v299_v48  ;;  %v304_v54 = vshll.u32 %v303_v52, 23 }
  0x9f   : > { %v305_v56 = vor.u32 4788187, %v304_v54  ;;  %v308_v57 = vcvt.s32.f32 %v301_v53 }
  0xa1   : > { %v306_v58 = vand.u32 2147483647, %v305_v56 }
  0xa3   : > { %v309_v59 = vmul.f32 %v308_v57, %v306_v58 }
  0xa5   : > { %v310_v60 = vxor.u32 2147483648, %v309_v59 }
  0xa7   : > { %v311_v61 = vsel %vm228_vm7, %v310_v60, %v309_v59 }
  0xa8   : > { %v314_v63 = vsel %vm227_vm8, %v730_v33, %v311_v61 }
  0xa9   : > { %495 = vcosq.f32 %v314_v63 }
  0xaa   : > { %497 = vsinq.f32 %v314_v63 }
  0xb6   : > { %v496_v5 = vpop.eup %495 }
  0xb7   : > { %v498_v7 = vpop.eup %497  ;;  %v325_v8 = vxor.u32 2147483648, %v496_v5 }
  0xb8   : > { %v322_v9 = vxor.u32 2147483648, %v498_v7 }
  0xb9   : > { %v326_v10 = vsel %vm324_vm10, %v325_v8, %v498_v7 }
  0xba   : > { %v323_v12 = vsel %vm321_vm12, %v496_v5, %v322_v9 }
  0xbb   : > { %v327_v13 = vsel %vm320_vm13, %v323_v12, %v326_v10 }
  0xbc   : > { %v328_v14 = vsel %vm318_vm14, nan, %v327_v13 }
  0xbd   : > { %v329_v15 = vmul.f32 %v328_v14, %v224_v11 }
  0xbf   : > { %v330_v17 = vadd.f32 1.0, %v329_v15 }
  0xc1   : > { %v332_v33 = vmul.f32 %v331_v16, %v330_v17 }
  0xc3   : > { %333 = vst [vmem:[%s159_s15] sm:$0xff] %v332_v33 }
  0xc4   : > { %540 = shalt.err (!%p537_p10)
}
  0xc5   : > { %s541_s3 = scalar_lea.hbm %s346_s27, 128  ;;  %s545_s5 = scalar_lea.hbm %s800_s2, 256 }
  0xc6   : > { %p542_p2 = scmp.ne.s32.totalorder %s346_s27, %s541_s3  ;;  %p546_p7 = scmp.lt.s32.totalorder %s346_s27, %s800_s2 }
  0xc7   : > { %p547_p0 = scmp.lt.s32.totalorder %s545_s5, %s541_s3 }
  0xc8   : > { %p543_p4 = pnand %p542_p2, %p811_p12 }
  0xc9   : > { %p548_p6 = por %p547_p0, %p546_p7 }
  0xca   : > { %p544_p9 = pneg %p543_p4 }
  0xcc   : > { %p549_p11 = pnand %p548_p6, %p544_p9 }
  0xce   : > { %552 = shalt.err (!%p549_p11)
}
  0xcf   : > { %441 = dma.vmem_to_hbm [thread:$0]  (%p811_p12), %s758_s17, 128, %s346_s27, %s335_s29  }
  0xd0 PF: > { %s360_s8 = sand.u32 1, %s579_s11   ;;  %p812_p13 = scmp.ne.s32.totalorder %s806_s23, 0 }
  0xd1   : > { %p813_p1 = scmp.ge.s32.totalorder %s591_s14, 2  ;;  %s361_s9 = scalar_lea.sflag [#allocation5], %s360_s8 }
  0xd3   : > { %p448_p3 = pnand %p813_p1, %p812_p13 }
  0xd5   : > { %p449_p5 = pneg %p448_p3 }
  0xd7   : > { %574 = dma.done.wait (%p449_p5), %s361_s9, 128  }
  0xd8   : > { %576 = vsyncadd (%p449_p5), %s361_s9, 4294967168  ;;  %p16_p8 = scmp.ge.s32.totalorder %s644_s16, 4   ;;  %s814_s11 = smov %s583_s12 }
  0xd9   : > { %s815_s12 = smov %s587_s13  ;;  %s816_s13 = smov %s656_s19 }
  0xda   : > { %s817_s14 = smov %s644_s16  ;;  %18 = sbr.rel (!%p16_p8) target bundleno = 7 (0x7), region = 73 }
  0xdf   :  { %366 = vsyncpa [#allocation4], 1 }
  0xe0   :  { %368 = vsyncpa [#allocation4 + $0x1], 1 }
  0xe1   :  { %369 = vsyncpa [#allocation5], 1 }
  0xe2   :  { %371 = vsyncpa [#allocation5 + $0x1], 1 }

</bundles_post_ra>
